<compile_context>
chip_gen: v7x
topology: tpu7x:2x2x1
jax: 0.10.0
libtpu: 0.0.40
codegen_flags: <defaults>
</compile_context>

<pallas_src>
import jax
import jax.numpy as jnp
from jax.experimental import pallas as pl
from jax.experimental.pallas import tpu as pltpu


def _round_up(n: int, m: int) -> int:
    return ((n + m - 1) // m) * m


def _cdiv(a: int, b: int) -> int:
    return (a + b - 1) // b


def _vmem_limit_bytes() -> int:
    """~75% of physical VMEM (48 MiB on v7x, 96 MiB on v5e/v6e); safe fallback 48 MiB."""
    try:
        cap = int(pltpu.get_tpu_info().vmem_capacity_bytes)
    except Exception:
        cap = 64 * 1024 * 1024
    return int(0.75 * cap)


def _pick_tk(Hp: int, tk_target: int) -> int:
    """Largest multiple-of-128 chunk <= tk_target that divides Hp (Hp is 128-aligned)."""
    units = Hp // 128
    target_units = max(1, tk_target // 128)
    best = 1
    for d in range(1, units + 1):
        if units % d == 0 and d <= target_units:
            best = d
    return best * 128


# ---------------------------------------------------------------------------
# Kernels
# ---------------------------------------------------------------------------

def _seqblock_resident_kernel(x_ref, w1_ref, b1_ref, w2_ref, b2_ref, o_ref):
    # One row tile of the batch per grid step; weights/biases have constant index_maps
    # and Buffered(1), so a single copy stays resident in VMEM for the whole grid.
    x = x_ref[...]                                                          # (tm, Dp)
    h = jnp.dot(x, w1_ref[...], preferred_element_type=jnp.float32)        # MXU
    h = h + b1_ref[...].astype(jnp.float32)                                 # bias (1, Hp)
    h = jnp.maximum(h, 0.0)                                                 # ReLU on VPU
    y = jnp.dot(h.astype(w2_ref.dtype), w2_ref[...],
                preferred_element_type=jnp.float32)                         # MXU
    y = y + b2_ref[...].astype(jnp.float32)                                 # bias (1, Dp)
    o_ref[...] = (y + x.astype(jnp.float32)).astype(o_ref.dtype)            # residual skip


def _seqblock_ktiled_kernel(x_ref, w1_ref, b1_ref, w2_ref, b2_ref, o_ref, acc_ref):
    # Grid = (row tiles, hidden chunks). ReLU is elementwise over H, so the second
    # matmul can be accumulated chunk-by-chunk in an f32 VMEM scratch.
    k = pl.program_id(1)

    @pl.when(k == 0)
    def _():
        acc_ref[...] = jnp.zeros_like(acc_ref)

    x = x_ref[...]                                                          # (tm, Dp)
    h = jnp.dot(x, w1_ref[...], preferred_element_type=jnp.float32)        # (tm, tk)
    h = h + b1_ref[...].astype(jnp.float32)
    h = jnp.maximum(h, 0.0)
    acc_ref[...] += jnp.dot(h.astype(w2_ref.dtype), w2_ref[...],
                            preferred_element_type=jnp.float32)             # (tm, Dp)

    @pl.when(k == pl.num_programs(1) - 1)
    def _():
        o_ref[...] = (acc_ref[...] + b2_ref[...].astype(jnp.float32)
                      + x.astype(jnp.float32)).astype(o_ref.dtype)


# ---------------------------------------------------------------------------
# Wrappers
# ---------------------------------------------------------------------------

def pad_params(w1, b1, w2, b2, lane: int = 128):
    """Pad parameters to lane-dense feature dims ONCE (hoisted out of the hot path).

    w1: (D, H), b1: (H,), w2: (H, D), b2: (D,). Zero padding is exact for this op.
    """
    D, H = w1.shape
    assert w2.shape == (H, D)
    Dp, Hp = _round_up(D, lane), _round_up(H, lane)
    b1 = jnp.reshape(b1, (1, H))
    b2 = jnp.reshape(b2, (1, D))
    if Dp != D or Hp != H:
        w1 = jnp.pad(w1, ((0, Dp - D), (0, Hp - H)))
        b1 = jnp.pad(b1, ((0, 0), (0, Hp - H)))
        w2 = jnp.pad(w2, ((0, Hp - H), (0, Dp - D)))
        b2 = jnp.pad(b2, ((0, 0), (0, Dp - D)))
    return dict(w1=w1, b1=b1, w2=w2, b2=b2, D=D, H=H)


def sequential_block(x, params, *, tm_target=512, tk_target=512, force_ktile=False):
    """Fused [Linear -> ReLU -> Linear] + residual.  x: (M, D); params from pad_params."""
    M, D = x.shape
    assert D == params["D"], "feature dim mismatch"
    w1, b1, w2, b2 = params["w1"], params["b1"], params["w2"], params["b2"]
    Dp, Hp = w1.shape

    # --- Row tiling: balance tiles (no gross M-padding), >=2 tiles for medium/large M
    # so both v7x TensorCores get work on the "parallel" grid axis. ---
    n_tiles = _cdiv(M, tm_target)
    if M >= 256:
        n_tiles = max(n_tiles, 2)
    tm = _round_up(_cdiv(M, n_tiles), 8)
    Mp = n_tiles * tm

    x_itemsize = jnp.dtype(x.dtype).itemsize
    w_itemsize = jnp.dtype(w1.dtype).itemsize

    vmem_budget = _vmem_limit_bytes()
    # VMEM needed by the weight-resident path: single-buffered weights/biases,
    # double-buffered x/out tiles, plus the compiler-managed f32 `h` intermediate
    # (and its cast copy for the second matmul) and the f32 y epilogue.
    resident_need = (
        (Dp * Hp + Hp * Dp + Hp + Dp) * w_itemsize
        + 4 * tm * Dp * x_itemsize
        + tm * Hp * (4 + w_itemsize)
        + tm * Dp * 4
    )
    use_ktile = force_ktile or resident_need > int(0.8 * vmem_budget)

    # Pad x only when needed (skipped entirely for aligned shapes).
    if Mp != M or Dp != D:
        x_p = jnp.pad(x, ((0, Mp - M), (0, Dp - D)))
    else:
        x_p = x

    flops = 2 * 2 * Mp * Dp * Hp  # two matmuls
    bytes_accessed = (x_itemsize * (2 * Mp * Dp)
                      + w_itemsize * (2 * Dp * Hp + Hp + Dp))
    cost = pl.CostEstimate(flops=int(flops), transcendentals=0,
                           bytes_accessed=int(bytes_accessed))

    if not use_ktile:
        out_p = pl.pallas_call(
            _seqblock_resident_kernel,
            out_shape=jax.ShapeDtypeStruct((Mp, Dp), x.dtype),
            grid_spec=pltpu.PrefetchScalarGridSpec(
                num_scalar_prefetch=0,
                grid=(Mp // tm,),
                in_specs=[
                    pl.BlockSpec((tm, Dp), lambda i: (i, 0)),     # x row tile (pipelined)
                    pl.BlockSpec((Dp, Hp), lambda i: (0, 0),
                                 pipeline_mode=pl.Buffered(1)),   # W1 resident, 1 buffer
                    pl.BlockSpec((1, Hp), lambda i: (0, 0),
                                 pipeline_mode=pl.Buffered(1)),   # b1
                    pl.BlockSpec((Hp, Dp), lambda i: (0, 0),
                                 pipeline_mode=pl.Buffered(1)),   # W2
                    pl.BlockSpec((1, Dp), lambda i: (0, 0),
                                 pipeline_mode=pl.Buffered(1)),   # b2
                ],
                out_specs=pl.BlockSpec((tm, Dp), lambda i: (i, 0)),
            ),
            compiler_params=pltpu.CompilerParams(
                dimension_semantics=("parallel",),
                vmem_limit_bytes=vmem_budget,
            ),
            cost_estimate=cost,
        )(x_p, w1, b1, w2, b2)
    else:
        tk = _pick_tk(Hp, tk_target)
        out_p = pl.pallas_call(
            _seqblock_ktiled_kernel,
            out_shape=jax.ShapeDtypeStruct((Mp, Dp), x.dtype),
            grid_spec=pltpu.PrefetchScalarGridSpec(
                num_scalar_prefetch=0,
                grid=(Mp // tm, Hp // tk),
                in_specs=[
                    pl.BlockSpec((tm, Dp), lambda i, k: (i, 0)),  # x (constant over k)
                    pl.BlockSpec((Dp, tk), lambda i, k: (0, k)),  # W1 hidden chunk
                    pl.BlockSpec((1, tk), lambda i, k: (0, k)),   # b1 hidden chunk
                    pl.BlockSpec((tk, Dp), lambda i, k: (k, 0)),  # W2 hidden chunk
                    pl.BlockSpec((1, Dp), lambda i, k: (0, 0),
                                 pipeline_mode=pl.Buffered(1)),   # b2 resident
                ],
                out_specs=pl.BlockSpec((tm, Dp), lambda i, k: (i, 0)),
                scratch_shapes=[pltpu.VMEM((tm, Dp), jnp.float32)],
            ),
            compiler_params=pltpu.CompilerParams(
                dimension_semantics=("parallel", "arbitrary"),
                vmem_limit_bytes=vmem_budget,
            ),
            cost_estimate=cost,
        )(x_p, w1, b1, w2, b2)

    if Mp != M or Dp != D:
        return out_p[:M, :D]
    return out_p


def reference(x, w1, b1, w2, b2):
    identity = x
    h = jnp.maximum(x @ w1 + jnp.reshape(b1, (1, -1)), 0.0)
    y = h @ w2 + jnp.reshape(b2, (1, -1))
    return y + identity


if __name__ == "__main__":
    key = jax.random.PRNGKey(0)
    keys = jax.random.split(key, 8)

    # Small shapes consistent with the module: batch*seq=16, D=32, H=64, residual=True.
    M, D, H = 16, 32, 64
    x = jax.random.normal(keys[0], (M, D), dtype=jnp.float32)
    w1 = jax.random.normal(keys[1], (D, H), dtype=jnp.float32) * (1.0 / jnp.sqrt(D))
    b1 = jax.random.normal(keys[2], (H,), dtype=jnp.float32) * 0.01
    w2 = jax.random.normal(keys[3], (H, D), dtype=jnp.float32) * (1.0 / jnp.sqrt(H))
    b2 = jax.random.normal(keys[4], (D,), dtype=jnp.float32) * 0.01

    params = pad_params(w1, b1, w2, b2)  # pad once, hoisted out of the hot path

    # Resident-weight path.
    out = jax.block_until_ready(sequential_block(x, params))
    ref = reference(x, w1, b1, w2, b2)
    assert out.shape == ref.shape and out.dtype == ref.dtype
    assert jnp.allclose(out, ref, atol=1e-5, rtol=1e-5), "resident path mismatch"

    # Ragged M (not a multiple of 8): exercises tile balancing + row padding + tail slice.
    M2 = 20
    x2 = jax.random.normal(keys[5], (M2, D), dtype=jnp.float32)
    out2 = jax.block_until_ready(sequential_block(x2, params, tm_target=128))
    ref2 = reference(x2, w1, b1, w2, b2)
    assert out2.shape == ref2.shape
    assert jnp.allclose(out2, ref2, atol=1e-5, rtol=1e-5), "ragged-M mismatch"

    # K-tiled fallback path (forced): multiple hidden chunks, accumulator init/finalize.
    D3, H3, M3 = 64, 256, 24
    x3 = jax.random.normal(keys[6], (M3, D3), dtype=jnp.float32)
    w1b = jax.random.normal(keys[7], (D3, H3), dtype=jnp.float32) * (1.0 / jnp.sqrt(D3))
    b1b = jnp.full((H3,), 0.02, jnp.float32)
    w2b = jax.random.normal(keys[1], (H3, D3), dtype=jnp.float32) * (1.0 / jnp.sqrt(H3))
    b2b = jnp.full((D3,), -0.01, jnp.float32)
    params3 = pad_params(w1b, b1b, w2b, b2b)
    out3 = jax.block_until_ready(
        sequential_block(x3, params3, tk_target=128, force_ktile=True))
    ref3 = reference(x3, w1b, b1b, w2b, b2b)
    assert jnp.allclose(out3, ref3, atol=1e-5, rtol=1e-5), "k-tiled path mismatch"

    # bf16 path (recommended dtype on v6e/v7x): f32 accumulation inside; h is re-quantized
    # to bf16 before the second matmul, so compare with a bf16-aware tolerance.
    params_bf16 = pad_params(w1.astype(jnp.bfloat16), b1.astype(jnp.bfloat16),
                             w2.astype(jnp.bfloat16), b2.astype(jnp.bfloat16))
    out_bf16 = jax.block_until_ready(
        sequential_block(x.astype(jnp.bfloat16), params_bf16))
    ref_bf16 = reference(x.astype(jnp.bfloat16).astype(jnp.float32),
                         w1.astype(jnp.bfloat16).astype(jnp.float32),
                         b1.astype(jnp.bfloat16).astype(jnp.float32),
                         w2.astype(jnp.bfloat16).astype(jnp.float32),
                         b2.astype(jnp.bfloat16).astype(jnp.float32))
    assert out_bf16.shape == (M, D) and out_bf16.dtype == jnp.bfloat16
    assert jnp.allclose(out_bf16.astype(jnp.float32), ref_bf16,
                        atol=1e-1, rtol=5e-2), "bf16 path mismatch beyond bf16 tolerance"

    print("KERNEL_OK")
</pallas_src>

<mosaic_0001>
module attributes {stable_mosaic.version = 11 : i64} {
  func.func @_seqblock_resident_kernel(%arg0: i32, %arg1: memref<16x128xf32, #tpu.memory_space<vmem>>, %arg2: memref<128x128xf32, #tpu.memory_space<vmem>>, %arg3: memref<1x128xf32, #tpu.memory_space<vmem>>, %arg4: memref<128x128xf32, #tpu.memory_space<vmem>>, %arg5: memref<1x128xf32, #tpu.memory_space<vmem>>, %arg6: memref<16x128xf32, #tpu.memory_space<vmem>>) attributes {dimension_semantics = [#tpu.dimension_semantics<parallel>], iteration_bounds = array<i64: 1>, scalar_prefetch = 0 : i64, scratch_operands = 0 : i64, tpu.core_type = #tpu.core_type<tc>, window_params = [{transform_indices = @transform_0, window_bounds = array<i64: 16, 128>}, {pipeline_mode = #tpu.pipeline_mode<synchronous>, transform_indices = @transform_1, window_bounds = array<i64: 128, 128>}, {pipeline_mode = #tpu.pipeline_mode<synchronous>, transform_indices = @transform_2, window_bounds = array<i64: 1, 128>}, {pipeline_mode = #tpu.pipeline_mode<synchronous>, transform_indices = @transform_3, window_bounds = array<i64: 128, 128>}, {pipeline_mode = #tpu.pipeline_mode<synchronous>, transform_indices = @transform_4, window_bounds = array<i64: 1, 128>}, {transform_indices = @transform_5, window_bounds = array<i64: 16, 128>}]} {
    %c0 = arith.constant 0 : index
    %c0_0 = arith.constant 0 : index
    %0 = vector.load %arg1[%c0, %c0_0] : memref<16x128xf32, #tpu.memory_space<vmem>>, vector<16x128xf32>
    %c0_1 = arith.constant 0 : index
    %c0_2 = arith.constant 0 : index
    %1 = vector.load %arg2[%c0_1, %c0_2] : memref<128x128xf32, #tpu.memory_space<vmem>>, vector<128x128xf32>
    %cst = arith.constant dense<0.000000e+00> : vector<16x128xf32>
    %2 = tpu.matmul %0, %1, %cst {dimension_numbers = #tpu.dot_dimension_numbers<[1], [0], [0], [1], [0, 0, 1, 1], [], []>} : vector<16x128xf32>, vector<128x128xf32>, vector<16x128xf32> -> vector<16x128xf32>
    %c0_3 = arith.constant 0 : index
    %c0_4 = arith.constant 0 : index
    %3 = vector.load %arg3[%c0_3, %c0_4] : memref<1x128xf32, #tpu.memory_space<vmem>>, vector<1x128xf32>
    %4 = vector.broadcast %3 : vector<1x128xf32> to vector<16x128xf32>
    %5 = arith.addf %2, %4 : vector<16x128xf32>
    %cst_5 = arith.constant 0.000000e+00 : f32
    %6 = vector.broadcast %cst_5 : f32 to vector<16x128xf32>
    %7 = arith.maximumf %5, %6 : vector<16x128xf32>
    %c0_6 = arith.constant 0 : index
    %c0_7 = arith.constant 0 : index
    %8 = vector.load %arg4[%c0_6, %c0_7] : memref<128x128xf32, #tpu.memory_space<vmem>>, vector<128x128xf32>
    %cst_8 = arith.constant dense<0.000000e+00> : vector<16x128xf32>
    %9 = tpu.matmul %7, %8, %cst_8 {dimension_numbers = #tpu.dot_dimension_numbers<[1], [0], [0], [1], [0, 0, 1, 1], [], []>} : vector<16x128xf32>, vector<128x128xf32>, vector<16x128xf32> -> vector<16x128xf32>
    %c0_9 = arith.constant 0 : index
    %c0_10 = arith.constant 0 : index
    %10 = vector.load %arg5[%c0_9, %c0_10] : memref<1x128xf32, #tpu.memory_space<vmem>>, vector<1x128xf32>
    %11 = vector.broadcast %10 : vector<1x128xf32> to vector<16x128xf32>
    %12 = arith.addf %9, %11 : vector<16x128xf32>
    %13 = arith.addf %12, %0 : vector<16x128xf32>
    %c0_11 = arith.constant 0 : index
    %c0_12 = arith.constant 0 : index
    %14 = vector.load %arg6[%c0_11, %c0_12] : memref<16x128xf32, #tpu.memory_space<vmem>>, vector<16x128xf32>
    tpu.vector_store %arg6[%c0_11, %c0_12], %13 {strides = array<i32>} : memref<16x128xf32, #tpu.memory_space<vmem>>, vector<16x128xf32>,
    return
  }
  func.func @transform_0(%arg0: i32) -> (i32, i32) {
    %c0_i32 = arith.constant 0 : i32
    %c0_i32_0 = arith.constant 0 : i32
    return %arg0, %c0_i32 : i32, i32
  }
  func.func @transform_1(%arg0: i32) -> (i32, i32) {
    %c0_i32 = arith.constant 0 : i32
    %c0_i32_0 = arith.constant 0 : i32
    %c0_i32_1 = arith.constant 0 : i32
    return %c0_i32, %c0_i32_0 : i32, i32
  }
  func.func @transform_2(%arg0: i32) -> (i32, i32) {
    %c0_i32 = arith.constant 0 : i32
    %c0_i32_0 = arith.constant 0 : i32
    %c0_i32_1 = arith.constant 0 : i32
    return %c0_i32, %c0_i32_0 : i32, i32
  }
  func.func @transform_3(%arg0: i32) -> (i32, i32) {
    %c0_i32 = arith.constant 0 : i32
    %c0_i32_0 = arith.constant 0 : i32
    %c0_i32_1 = arith.constant 0 : i32
    return %c0_i32, %c0_i32_0 : i32, i32
  }
  func.func @transform_4(%arg0: i32) -> (i32, i32) {
    %c0_i32 = arith.constant 0 : i32
    %c0_i32_0 = arith.constant 0 : i32
    %c0_i32_1 = arith.constant 0 : i32
    return %c0_i32, %c0_i32_0 : i32, i32
  }
  func.func @transform_5(%arg0: i32) -> (i32, i32) {
    %c0_i32 = arith.constant 0 : i32
    %c0_i32_0 = arith.constant 0 : i32
    return %arg0, %c0_i32 : i32, i32
  }
}

</mosaic_0001>

<bundles_post_ra>
// kernel: tpu_custom_call.1
= control target key start
LH: loop header
LB: loop body
LE: loop exit
PB: predicated region body
PF: predicated region fallthrough
CT: control target
= control target key end

     0   :  { %10 = vsyncpa [#allocation3], 0  ;;  %s669_s0 = inlined_call_operand.hbm [shape: f32[16,128], index: 0, kind: input, shape index: {}]   ;;  %s670_s1 = inlined_call_operand.hbm [shape: f32[128,128], index: 1, kind: input, shape index: {}]   ;;  %s671_s2 = inlined_call_operand.vmem [shape: f32[1,128], index: 2, kind: input, shape index: {}]   ;;  %s672_s3 = inlined_call_operand.hbm [shape: f32[128,128], index: 3, kind: input, shape index: {}]   ;;  %s673_s4 = inlined_call_operand.vmem [shape: f32[1,128], index: 4, kind: input, shape index: {}]   ;;  %s674_s5 = inlined_call_operand.hbm [shape: f32[16,128], index: 5, kind: output, shape index: {}]  }
   0x1   :  { %11 = vsyncpa [#allocation6], 0 }
   0x2   :  { %12 = vsyncpa [#allocation4], 0  ;;  %s556_s18 = smov [#allocation5]   ;;  %s557_s20 = smov [#allocation2]  }
   0x3   :  { %s30_s19 = sshll.u32 %s556_s18, 4  ;;  %s18_s21 = sshll.u32 %s557_s20, 4  ;;  %s31_s19 = int_to_ptr.vmem [resolvable:$true] %s30_s19  ;;  %s592_s21 = int_to_ptr.vmem [resolvable:$true] %s18_s21 }
   0x4   :  { %s462_s24 = scalar_lea.hbm %s670_s1, 2048 }
   0x5   :  { %p463_p0 = scmp.ne.s32.totalorder %s670_s1, %s462_s24  ;;  %p466_p1 = scmp.lt.u32.totalorder %s462_s24, %s670_s1 }
   0x7   :  { %p468_p2 = pnand %p466_p1, %p463_p0 }
   0x9   :  { %471 = shalt.err (!%p468_p2)
}
   0xa   :  { %s472_s29 = scalar_lea.vmem %s31_s19, 2048  ;;  %p477_p4 = scmp.lt.s32.totalorder %s31_s19, %s31_s19 }
   0xb   :  { %p473_p3 = scmp.ne.s32.totalorder %s31_s19, %s472_s29  ;;  %p478_p5 = scmp.lt.s32.totalorder %s472_s29, %s472_s29 }
   0xd   :  { %p479_p6 = por %p478_p5, %p477_p4 }
   0xf   :  { %p480_p7 = pnand %p479_p6, %p473_p3 }
  0x11   :  { %483 = shalt.err (!%p480_p7)
}
  0x12   :  { %s558_s30 = smov 128   ;;  %s559_s6 = smov 8  }
  0x13   :  { %36 = dma.hbm_to_vmem [thread:$0]  %s670_s1, 2048, %s31_s19, [#allocation6], %s558_s30, %s558_s30, %s559_s6  }
  0x14   :  { %s484_s11 = scalar_lea.hbm %s669_s0, 256 }
  0x15   :  { %p485_p8 = scmp.ne.s32.totalorder %s669_s0, %s484_s11  ;;  %p488_p9 = scmp.lt.u32.totalorder %s484_s11, %s669_s0 }
  0x17   :  { %p490_p10 = pnand %p488_p9, %p485_p8 }
  0x19   :  { %493 = shalt.err (!%p490_p10)
}
  0x1a   :  { %s494_s16 = scalar_lea.vmem %s592_s21, 256  ;;  %p499_p12 = scmp.lt.s32.totalorder %s592_s21, %s592_s21 }
  0x1b   :  { %p495_p11 = scmp.ne.s32.totalorder %s592_s21, %s494_s16  ;;  %p500_p13 = scmp.lt.s32.totalorder %s494_s16, %s494_s16 }
  0x1d   :  { %p501_p0 = por %p500_p13, %p499_p12 }
  0x1f   :  { %p502_p1 = pnand %p501_p0, %p495_p11 }
  0x21   :  { %505 = shalt.err (!%p502_p1)
}
  0x22   :  { %24 = dma.hbm_to_vmem [thread:$0]  %s669_s0, 256, %s592_s21, [#allocation3], %s558_s30, %s558_s30, %s559_s6  }
  0x23   :  { %s560_s18 = smov [#allocation7]   ;;  %s506_s23 = scalar_lea.hbm %s672_s3, 2048 }
  0x24   :  { %s44_s19 = sshll.u32 %s560_s18, 4  ;;  %p507_p2 = scmp.ne.s32.totalorder %s672_s3, %s506_s23  ;;  %s45_s19 = int_to_ptr.vmem [resolvable:$true] %s44_s19 }
  0x25   :  { %p510_p3 = scmp.lt.u32.totalorder %s506_s23, %s672_s3 }
  0x27   :  { %p512_p4 = pnand %p510_p3, %p507_p2 }
  0x29   :  { %515 = shalt.err (!%p512_p4)
}
  0x2a   :  { %s516_s28 = scalar_lea.vmem %s45_s19, 2048  ;;  %p521_p6 = scmp.lt.s32.totalorder %s45_s19, %s45_s19 }
  0x2b   :  { %p517_p5 = scmp.ne.s32.totalorder %s45_s19, %s516_s28  ;;  %p522_p7 = scmp.lt.s32.totalorder %s516_s28, %s516_s28 }
  0x2d   :  { %p523_p8 = por %p522_p7, %p521_p6 }
  0x2f   :  { %p524_p9 = pnand %p523_p8, %p517_p5 }
  0x31   :  { %527 = shalt.err (!%p524_p9)
}
  0x32   :  { %50 = dma.hbm_to_vmem [thread:$0]  %s672_s3, 2048, %s45_s19, [#allocation6], %s558_s30, %s558_s30, %s559_s6  }
  0x33   :  { %550 = dma.done.wait [#allocation3], 256  }
  0x34   :  { %551 = vsyncadd [#allocation3], 4294967040 }
  0x35   :  { %552 = dma.done.wait [#allocation6], 4096  }
  0x36   :  { %553 = vsyncadd [#allocation6], 4294963200  ;;  %v64_v0 = vld [vmem:[#allocation5] sm:$0xff]  ;;  %v65_v1 = vld [vmem:[#allocation5 + $0x8] sm:$0xff]  ;;  %s561_s9 = smov [#allocation8]  }
  0x37   :  { %v66_v2 = vld [vmem:[#allocation5 + $0x10] sm:$0xff]  ;;  %v392_v3 = vpack.c.bf16 %v65_v1, %v64_v0  ;;  %v67_v4 = vld [vmem:[#allocation5 + $0x18] sm:$0xff]  ;;  %v68_v6 = vld [vmem:[#allocation5 + $0x20] sm:$0xff]  ;;  %s271_s10 = sshll.u32 %s561_s9, 4  ;;  %s272_s10 = int_to_ptr.vmem [resolvable:$true] %s271_s10 }
  0x38   :  { %v396_v5 = vpack.c.bf16 %v67_v4, %v66_v2  ;;  %v69_v7 = vld [vmem:[#allocation5 + $0x28] sm:$0xff]  ;;  %v70_v9 = vld [vmem:[#allocation5 + $0x30] sm:$0xff]  ;;  %v71_v10 = vld [vmem:[#allocation5 + $0x38] sm:$0xff]  ;;  %p533_p11 = scmp.lt.s32.totalorder %s272_s10, %s272_s10 }
  0x39   :  { %393 = vmatprep.subr.bf16.mxu0 %v392_v3  ;;  %v400_v8 = vpack.c.bf16 %v69_v7, %v68_v6  ;;  %v644_v11 = vld [vmem:[#allocation2] sm:$0xff]  ;;  %v164_v12 = vld [vmem:[#allocation7] sm:$0xff]  ;;  %v165_v13 = vld [vmem:[#allocation7 + $0x8] sm:$0xff]  ;;  %v404_v20 = vpack.c.bf16 %v71_v10, %v70_v9 }
  0x3a   :  { %395 = vmatpush3.bf16.msra.mxu0 %v392_v3  ;;  %354 = vmatprep.mubr.f32.mxu0 %v644_v11  ;;  %v166_v14 = vld [vmem:[#allocation7 + $0x10] sm:$0xff]  ;;  %v424_v15 = vpack.c.bf16 %v165_v13, %v164_v12  ;;  %v167_v16 = vld [vmem:[#allocation7 + $0x18] sm:$0xff]  ;;  %v168_v18 = vld [vmem:[#allocation7 + $0x20] sm:$0xff] }
  0x3b   :  { %397 = vmatprep.subr.bf16.mxu0 %v396_v5  ;;  %v428_v17 = vpack.c.bf16 %v167_v16, %v166_v14  ;;  %v169_v19 = vld [vmem:[#allocation7 + $0x28] sm:$0xff]  ;;  %v72_v21 = vld [vmem:[#allocation5 + $0x40] sm:$0xff]  ;;  %v170_v24 = vld [vmem:[#allocation7 + $0x30] sm:$0xff] }
  0x3c   :  { %425 = vmatprep.subr.bf16.mxu1 %v424_v15  ;;  %v73_v22 = vld [vmem:[#allocation5 + $0x48] sm:$0xff]  ;;  %v432_v23 = vpack.c.bf16 %v169_v19, %v168_v18  ;;  %v171_v25 = vld [vmem:[#allocation7 + $0x38] sm:$0xff]  ;;  %v74_v27 = vld [vmem:[#allocation5 + $0x50] sm:$0xff] }
  0x3d   :  { %427 = vmatpush3.bf16.msra.mxu1 %v424_v15  ;;  %v408_v26 = vpack.c.bf16 %v73_v22, %v72_v21  ;;  %v75_v28 = vld [vmem:[#allocation5 + $0x58] sm:$0xff]  ;;  %v436_v29 = vpack.c.bf16 %v171_v25, %v170_v24  ;;  %v172_v30 = vld [vmem:[#allocation7 + $0x40] sm:$0xff]  ;;  %v173_v31 = vld [vmem:[#allocation7 + $0x48] sm:$0xff] }
  0x3e   :  { %399 = vmatpush3.bf16.msra.mxu0 %v396_v5  ;;  %429 = vmatprep.subr.bf16.mxu1 %v428_v17  ;;  %v412_v32 = vpack.c.bf16 %v75_v28, %v74_v27  ;;  %v76_v33 = vld [vmem:[#allocation5 + $0x60] sm:$0xff]  ;;  %v77_v34 = vld [vmem:[#allocation5 + $0x68] sm:$0xff]  ;;  %v440_v35 = vpack.c.bf16 %v173_v31, %v172_v30  ;;  %v174_v36 = vld [vmem:[#allocation7 + $0x50] sm:$0xff] }
  0x3f   :  { %401 = vmatprep.subr.bf16.mxu0 %v400_v8  ;;  %v175_v37 = vld [vmem:[#allocation7 + $0x58] sm:$0xff]  ;;  %v416_v38 = vpack.c.bf16 %v77_v34, %v76_v33  ;;  %v78_v39 = vld [vmem:[#allocation5 + $0x70] sm:$0xff]  ;;  %v176_v42 = vld [vmem:[#allocation7 + $0x60] sm:$0xff] }
  0x40   :  { %v79_v40 = vld [vmem:[#allocation5 + $0x78] sm:$0xff]  ;;  %v444_v41 = vpack.c.bf16 %v175_v37, %v174_v36  ;;  %v177_v43 = vld [vmem:[#allocation7 + $0x68] sm:$0xff]  ;;  %v178_v47 = vld [vmem:[#allocation7 + $0x70] sm:$0xff] }
  0x41   :  { %431 = vmatpush3.bf16.msra.mxu1 %v428_v17  ;;  %v420_v44 = vpack.c.bf16 %v79_v40, %v78_v39  ;;  %v448_v45 = vpack.c.bf16 %v177_v43, %v176_v42  ;;  %v63_v46 = vld [vmem:[#allocation2 + $0x8] sm:$0xff]  ;;  %v284_v50 = vld [vmem:[%s671_s2] ss:$0 sm:$0xff]  ;;  %s528_s2 = scalar_lea.vmem %s272_s10, 256 }
  0x42   :  { %403 = vmatpush3.bf16.msra.mxu0 %v400_v8  ;;  %433 = vmatprep.subr.bf16.mxu1 %v432_v23  ;;  %v179_v48 = vld [vmem:[#allocation7 + $0x78] sm:$0xff]  ;;  %v285_v57 = vld [vmem:[%s673_s4] ss:$0 sm:$0xff]  ;;  %p529_p10 = scmp.ne.s32.totalorder %s272_s10, %s528_s2  ;;  %p534_p12 = scmp.lt.s32.totalorder %s528_s2, %s528_s2 }
  0x43   :  { %405 = vmatprep.subr.bf16.mxu0 %v404_v20  ;;  %v452_v49 = vpack.c.bf16 %v179_v48, %v178_v47 }
  0x44   :  { %p535_p13 = por %p534_p12, %p533_p11 }
  0x45   :  { %435 = vmatpush3.bf16.msra.mxu1 %v432_v23 }
  0x46   :  { %407 = vmatpush3.bf16.msra.mxu0 %v404_v20  ;;  %437 = vmatprep.subr.bf16.mxu1 %v436_v29  ;;  %p536_p0 = pnand %p535_p13, %p529_p10 }
  0x47   :  { %409 = vmatprep.subr.bf16.mxu0 %v408_v26 }
  0x49   :  { %439 = vmatpush3.bf16.msra.mxu1 %v436_v29 }
  0x4a   :  { %411 = vmatpush3.bf16.msra.mxu0 %v408_v26  ;;  %441 = vmatprep.subr.bf16.mxu1 %v440_v35 }
  0x4b   :  { %413 = vmatprep.subr.bf16.mxu0 %v412_v32 }
  0x4d   :  { %443 = vmatpush3.bf16.msra.mxu1 %v440_v35 }
  0x4e   :  { %415 = vmatpush3.bf16.msra.mxu0 %v412_v32  ;;  %445 = vmatprep.subr.bf16.mxu1 %v444_v41 }
  0x4f   :  { %417 = vmatprep.subr.bf16.mxu0 %v416_v38 }
  0x51   :  { %447 = vmatpush3.bf16.msra.mxu1 %v444_v41 }
  0x52   :  { %419 = vmatpush3.bf16.msra.mxu0 %v416_v38  ;;  %449 = vmatprep.subr.bf16.mxu1 %v448_v45 }
  0x53   :  { %421 = vmatprep.subr.bf16.mxu0 %v420_v44 }
  0x55   :  { %451 = vmatpush3.bf16.msra.mxu1 %v448_v45 }
  0x56   :  { %423 = vmatpush3.bf16.msra.mxu0 %v420_v44  ;;  %453 = vmatprep.subr.bf16.mxu1 %v452_v49 }
  0x59   :  { %355 = vmatmul.mubr.f32.vlgmr.msra.gmra.mrb[0].mxu0 %v63_v46  ;;  %455 = vmatpush3.bf16.msra.mxu1 %v452_v49 }
 0x12c   :  { %v356_v51 = vpop.f32.mrb[0].mxu0 }
 0x12d   :  { %v159_v52 = vadd.f32 %v356_v51, %v284_v50  ;;  %v153_v53 = vpop.f32.mrb[1].mxu0 }
 0x12e   :  { %v154_v54 = vadd.f32 %v284_v50, %v153_v53 }
 0x12f   :  { %v163_v56 = vmax.f32 %v159_v52, 0.0 }
 0x130   :  { %v162_v55 = vmax.f32 %v154_v54, 0.0 }
 0x132   :  { %389 = vmatprep.mubr.f32.mxu1 %v162_v55 }
 0x133   :  { %390 = vmatmul.mubr.f32.vlgmr.msra.gmra.mrb[0].mxu1 %v163_v56 }
 0x206   :  { %v391_v58 = vpop.f32.mrb[0].mxu1 }
 0x207   :  { %v259_v59 = vadd.f32 %v391_v58, %v285_v57  ;;  %v253_v60 = vpop.f32.mrb[1].mxu1 }
 0x208   :  { %v254_v61 = vadd.f32 %v285_v57, %v253_v60 }
 0x209   :  { %v263_v62 = vadd.f32 %v259_v59, %v63_v46 }
 0x20a   :  { %v262_v63 = vadd.f32 %v254_v61, %v644_v11 }
 0x20b   :  { %265 = vst [vmem:[#allocation8 + $0x8] sm:$0xff] %v263_v62 }
 0x20c   :  { %264 = vst [vmem:[#allocation8] sm:$0xff] %v262_v63 }
 0x20d   :  { %539 = shalt.err (!%p536_p0)
}
 0x20e   :  { %s540_s12 = scalar_lea.hbm %s674_s5, 256 }
 0x20f   :  { %p541_p1 = scmp.ne.s32.totalorder %s674_s5, %s540_s12  ;;  %p544_p2 = scmp.lt.u32.totalorder %s540_s12, %s674_s5 }
 0x211   :  { %p546_p3 = pnand %p544_p2, %p541_p1 }
 0x213   :  { %549 = shalt.err (!%p546_p3)
}
 0x214   :  { %277 = dma.vmem_to_hbm [thread:$0]  %s272_s10, 256, %s674_s5, [#allocation4], %s558_s30, %s558_s30, %s559_s6  }
 0x215   :  { %554 = dma.done.wait [#allocation4], 256  }
 0x216   :  { %555 = vsyncadd [#allocation4], 4294967040 }
 0x217   :  { %281 = vsyncpa [#allocation3], 1 }
 0x218   :  { %282 = vsyncpa [#allocation6], 1 }
 0x219   :  { %283 = vsyncpa [#allocation4], 1 }

</bundles_post_ra>
